<compile_context>
chip_gen: v7x
topology: tpu7x:2x2x1
jax: 0.10.0
libtpu: 0.0.40
codegen_flags: <defaults>
</compile_context>

<pallas_src>
import functools

import jax
import jax.numpy as jnp
from jax.experimental import pallas as pl
from jax.experimental.pallas import tpu as pltpu

LN_EPS = 1e-5  # PyTorch nn.LayerNorm default


def _ffn_kernel(x_ref, gamma_ref, beta_ref, w1_ref, b1_ref, w2_ref, b2_ref, o_ref):
    # x_ref:      (TM, D)   token tile
    # gamma/beta: (1, D)    LayerNorm affine params
    # w1:         (D, H)    b1: (1, H)     (H = 2*D)
    # w2:         (H, D)    b2: (1, D)
    # o_ref:      (TM, D)

    # --- LayerNorm over last axis (statistics in f32) ---
    xf = x_ref[...].astype(jnp.float32)
    mean = jnp.mean(xf, axis=-1, keepdims=True)
    xc = xf - mean
    var = jnp.mean(xc * xc, axis=-1, keepdims=True)
    inv = jax.lax.rsqrt(var + LN_EPS)
    xn = xc * inv * gamma_ref[...].astype(jnp.float32) + beta_ref[...].astype(jnp.float32)

    # --- Linear1 + ReLU (dropout1 is identity at inference) ---
    # Matmul in the weights' native dtype (bf16 stays bf16 on the MXU),
    # f32 accumulation via preferred_element_type.
    h = jnp.dot(xn.astype(w1_ref.dtype), w1_ref[...],
                preferred_element_type=jnp.float32)
    h = jnp.maximum(h + b1_ref[...].astype(jnp.float32), 0.0)

    # --- Linear2 (dropout2 is identity at inference) ---
    out = jnp.dot(h.astype(w2_ref.dtype), w2_ref[...],
                  preferred_element_type=jnp.float32)
    out = out + b2_ref[...].astype(jnp.float32)

    o_ref[...] = out.astype(o_ref.dtype)


@functools.partial(jax.jit, static_argnames=("block_rows",))
def feed_forward_layer(x, gamma, beta, w1, b1, w2, b2, block_rows=256):
    """x: (B, S, D) -> (B, S, D). Fused LayerNorm + MLP Pallas kernel."""
    B, S, D = x.shape
    H = w1.shape[1]
    N = B * S
    x2d = x.reshape(N, D)

    # Token tile: largest of (block_rows, N). If the tile does not cover the
    # full token dim it must be a multiple of 8 (sublane constraint); the
    # partial last block (when tm does not divide N) is handled by Pallas
    # with bounded reads / masked writes, so no host-side padding is needed.
    if N <= block_rows:
        tm = N
    else:
        assert block_rows % 8 == 0, "block_rows must be a multiple of 8"
        tm = block_rows
    grid = (pl.cdiv(N, tm),)

    gamma2 = gamma.reshape(1, D)
    beta2 = beta.reshape(1, D)
    b1_2 = b1.reshape(1, H)
    b2_2 = b2.reshape(1, D)

    itemsize_x = jnp.dtype(x.dtype).itemsize
    itemsize_w = jnp.dtype(w1.dtype).itemsize
    cost = pl.CostEstimate(
        flops=4 * N * D * H,                       # two GEMMs: 2*N*D*H each
        transcendentals=N,                         # one rsqrt per token row
        bytes_accessed=(2 * N * D) * itemsize_x    # read x + write out
        + (w1.size + w2.size) * itemsize_w
        + (gamma.size + beta.size + b1.size + b2.size) * 4,
    )

    out2d = pl.pallas_call(
        _ffn_kernel,
        out_shape=jax.ShapeDtypeStruct((N, D), x.dtype),
        grid_spec=pltpu.PrefetchScalarGridSpec(
            num_scalar_prefetch=0,
            grid=grid,
            in_specs=[
                pl.BlockSpec((tm, D), lambda i: (i, 0)),   # x tile
                pl.BlockSpec((1, D), lambda i: (0, 0)),    # gamma (resident)
                pl.BlockSpec((1, D), lambda i: (0, 0)),    # beta  (resident)
                pl.BlockSpec((D, H), lambda i: (0, 0)),    # w1    (resident)
                pl.BlockSpec((1, H), lambda i: (0, 0)),    # b1    (resident)
                pl.BlockSpec((H, D), lambda i: (0, 0)),    # w2    (resident)
                pl.BlockSpec((1, D), lambda i: (0, 0)),    # b2    (resident)
            ],
            out_specs=pl.BlockSpec((tm, D), lambda i: (i, 0)),
        ),
        compiler_params=pltpu.CompilerParams(
            dimension_semantics=("parallel",),
            vmem_limit_bytes=64 * 1024 * 1024,
        ),
        cost_estimate=cost,
    )(x2d, gamma2, beta2, w1, b1_2, w2, b2_2)

    return out2d.reshape(B, S, D)


def init_params(key, dim):
    """Deterministic init mirroring the PyTorch module's _init_weights."""
    k1, k2 = jax.random.split(key)
    hidden = dim * 2
    # trunc_normal_(std=0.02) ~ truncated normal scaled by 0.02
    w1 = (jax.random.truncated_normal(k1, -2.0, 2.0, (dim, hidden), jnp.float32)
          * 0.02)
    w2 = (jax.random.truncated_normal(k2, -2.0, 2.0, (hidden, dim), jnp.float32)
          * 0.02)
    b1 = jnp.zeros((hidden,), jnp.float32)
    b2 = jnp.zeros((dim,), jnp.float32)
    gamma = jnp.ones((dim,), jnp.float32)   # LayerNorm weight = 1
    beta = jnp.zeros((dim,), jnp.float32)   # LayerNorm bias = 0
    return gamma, beta, w1, b1, w2, b2


def _reference(x, gamma, beta, w1, b1, w2, b2):
    xf = x.astype(jnp.float32)
    mean = jnp.mean(xf, axis=-1, keepdims=True)
    var = jnp.mean((xf - mean) ** 2, axis=-1, keepdims=True)
    xn = (xf - mean) * jax.lax.rsqrt(var + LN_EPS) * gamma + beta
    h = jnp.maximum(xn @ w1 + b1, 0.0)
    return (h @ w2 + b2).astype(x.dtype)


if __name__ == "__main__":
    key = jax.random.PRNGKey(0)
    kx, kp = jax.random.split(key)

    # Small but lane-dense shapes: D multiple of 128 keeps output stores unmasked.
    B, S, D = 2, 8, 128
    x = jax.random.normal(kx, (B, S, D), jnp.float32)
    gamma, beta, w1, b1, w2, b2 = init_params(kp, D)

    out = feed_forward_layer(x, gamma, beta, w1, b1, w2, b2)
    out = jax.block_until_ready(out)

    ref = _reference(x, gamma, beta, w1, b1, w2, b2)
    assert out.shape == (B, S, D)
    assert jnp.allclose(out, ref, atol=1e-4, rtol=1e-4), "mismatch vs reference"

    print("KERNEL_OK")
</pallas_src>

<mosaic_0001>
module attributes {stable_mosaic.version = 11 : i64} {
  func.func @_ffn_kernel(%arg0: i32, %arg1: memref<16x128xf32, #tpu.memory_space<vmem>>, %arg2: memref<1x128xf32, #tpu.memory_space<vmem>>, %arg3: memref<1x128xf32, #tpu.memory_space<vmem>>, %arg4: memref<128x256xf32, #tpu.memory_space<vmem>>, %arg5: memref<1x256xf32, #tpu.memory_space<vmem>>, %arg6: memref<256x128xf32, #tpu.memory_space<vmem>>, %arg7: memref<1x128xf32, #tpu.memory_space<vmem>>, %arg8: memref<16x128xf32, #tpu.memory_space<vmem>>) attributes {dimension_semantics = [#tpu.dimension_semantics<parallel>], iteration_bounds = array<i64: 1>, scalar_prefetch = 0 : i64, scratch_operands = 0 : i64, tpu.core_type = #tpu.core_type<tc>, window_params = [{transform_indices = @transform_0, window_bounds = array<i64: 16, 128>}, {pipeline_mode = #tpu.pipeline_mode<synchronous>, transform_indices = @transform_1, window_bounds = array<i64: 1, 128>}, {pipeline_mode = #tpu.pipeline_mode<synchronous>, transform_indices = @transform_2, window_bounds = array<i64: 1, 128>}, {pipeline_mode = #tpu.pipeline_mode<synchronous>, transform_indices = @transform_3, window_bounds = array<i64: 128, 256>}, {pipeline_mode = #tpu.pipeline_mode<synchronous>, transform_indices = @transform_4, window_bounds = array<i64: 1, 256>}, {pipeline_mode = #tpu.pipeline_mode<synchronous>, transform_indices = @transform_5, window_bounds = array<i64: 256, 128>}, {pipeline_mode = #tpu.pipeline_mode<synchronous>, transform_indices = @transform_6, window_bounds = array<i64: 1, 128>}, {transform_indices = @transform_7, window_bounds = array<i64: 16, 128>}]} {
    %c0 = arith.constant 0 : index
    %c0_0 = arith.constant 0 : index
    %0 = vector.load %arg1[%c0, %c0_0] : memref<16x128xf32, #tpu.memory_space<vmem>>, vector<16x128xf32>
    %cst = arith.constant dense<0.000000e+00> : vector<16xf32>
    %1 = vector.multi_reduction <add>, %0, %cst [1] : vector<16x128xf32> to vector<16xf32>
    %2 = vector.shape_cast %1 : vector<16xf32> to vector<16x1xf32>
    %cst_1 = arith.constant 1.280000e+02 : f32
    %3 = vector.broadcast %cst_1 : f32 to vector<16x1xf32>
    %4 = arith.divf %2, %3 : vector<16x1xf32>
    %5 = vector.broadcast %4 : vector<16x1xf32> to vector<16x128xf32>
    %6 = arith.subf %0, %5 : vector<16x128xf32>
    %7 = arith.mulf %6, %6 : vector<16x128xf32>
    %cst_2 = arith.constant dense<0.000000e+00> : vector<16xf32>
    %8 = vector.multi_reduction <add>, %7, %cst_2 [1] : vector<16x128xf32> to vector<16xf32>
    %9 = vector.shape_cast %8 : vector<16xf32> to vector<16x1xf32>
    %cst_3 = arith.constant 1.280000e+02 : f32
    %10 = vector.broadcast %cst_3 : f32 to vector<16x1xf32>
    %11 = arith.divf %9, %10 : vector<16x1xf32>
    %cst_4 = arith.constant 9.99999974E-6 : f32
    %12 = vector.broadcast %cst_4 : f32 to vector<16x1xf32>
    %13 = arith.addf %11, %12 : vector<16x1xf32>
    %14 = math.rsqrt %13 : vector<16x1xf32>
    %15 = vector.broadcast %14 : vector<16x1xf32> to vector<16x128xf32>
    %16 = arith.mulf %6, %15 : vector<16x128xf32>
    %c0_5 = arith.constant 0 : index
    %c0_6 = arith.constant 0 : index
    %17 = vector.load %arg2[%c0_5, %c0_6] : memref<1x128xf32, #tpu.memory_space<vmem>>, vector<1x128xf32>
    %18 = vector.broadcast %17 : vector<1x128xf32> to vector<16x128xf32>
    %19 = arith.mulf %16, %18 : vector<16x128xf32>
    %c0_7 = arith.constant 0 : index
    %c0_8 = arith.constant 0 : index
    %20 = vector.load %arg3[%c0_7, %c0_8] : memref<1x128xf32, #tpu.memory_space<vmem>>, vector<1x128xf32>
    %21 = vector.broadcast %20 : vector<1x128xf32> to vector<16x128xf32>
    %22 = arith.addf %19, %21 : vector<16x128xf32>
    %c0_9 = arith.constant 0 : index
    %c0_10 = arith.constant 0 : index
    %23 = vector.load %arg4[%c0_9, %c0_10] : memref<128x256xf32, #tpu.memory_space<vmem>>, vector<128x256xf32>
    %cst_11 = arith.constant dense<0.000000e+00> : vector<16x256xf32>
    %24 = tpu.matmul %22, %23, %cst_11 {dimension_numbers = #tpu.dot_dimension_numbers<[1], [0], [0], [1], [0, 0, 1, 1], [], []>} : vector<16x128xf32>, vector<128x256xf32>, vector<16x256xf32> -> vector<16x256xf32>
    %c0_12 = arith.constant 0 : index
    %c0_13 = arith.constant 0 : index
    %25 = vector.load %arg5[%c0_12, %c0_13] : memref<1x256xf32, #tpu.memory_space<vmem>>, vector<1x256xf32>
    %26 = vector.broadcast %25 : vector<1x256xf32> to vector<16x256xf32>
    %27 = arith.addf %24, %26 : vector<16x256xf32>
    %cst_14 = arith.constant 0.000000e+00 : f32
    %28 = vector.broadcast %cst_14 : f32 to vector<16x256xf32>
    %29 = arith.maximumf %27, %28 : vector<16x256xf32>
    %c0_15 = arith.constant 0 : index
    %c0_16 = arith.constant 0 : index
    %30 = vector.load %arg6[%c0_15, %c0_16] : memref<256x128xf32, #tpu.memory_space<vmem>>, vector<256x128xf32>
    %cst_17 = arith.constant dense<0.000000e+00> : vector<16x128xf32>
    %31 = tpu.matmul %29, %30, %cst_17 {dimension_numbers = #tpu.dot_dimension_numbers<[1], [0], [0], [1], [0, 0, 1, 1], [], []>} : vector<16x256xf32>, vector<256x128xf32>, vector<16x128xf32> -> vector<16x128xf32>
    %c0_18 = arith.constant 0 : index
    %c0_19 = arith.constant 0 : index
    %32 = vector.load %arg7[%c0_18, %c0_19] : memref<1x128xf32, #tpu.memory_space<vmem>>, vector<1x128xf32>
    %33 = vector.broadcast %32 : vector<1x128xf32> to vector<16x128xf32>
    %34 = arith.addf %31, %33 : vector<16x128xf32>
    %c0_20 = arith.constant 0 : index
    %c0_21 = arith.constant 0 : index
    %35 = vector.load %arg8[%c0_20, %c0_21] : memref<16x128xf32, #tpu.memory_space<vmem>>, vector<16x128xf32>
    tpu.vector_store %arg8[%c0_20, %c0_21], %34 {strides = array<i32>} : memref<16x128xf32, #tpu.memory_space<vmem>>, vector<16x128xf32>,
    return
  }
  func.func @transform_0(%arg0: i32) -> (i32, i32) {
    %c0_i32 = arith.constant 0 : i32
    %c0_i32_0 = arith.constant 0 : i32
    return %arg0, %c0_i32 : i32, i32
  }
  func.func @transform_1(%arg0: i32) -> (i32, i32) {
    %c0_i32 = arith.constant 0 : i32
    %c0_i32_0 = arith.constant 0 : i32
    %c0_i32_1 = arith.constant 0 : i32
    return %c0_i32, %c0_i32_0 : i32, i32
  }
  func.func @transform_2(%arg0: i32) -> (i32, i32) {
    %c0_i32 = arith.constant 0 : i32
    %c0_i32_0 = arith.constant 0 : i32
    %c0_i32_1 = arith.constant 0 : i32
    return %c0_i32, %c0_i32_0 : i32, i32
  }
  func.func @transform_3(%arg0: i32) -> (i32, i32) {
    %c0_i32 = arith.constant 0 : i32
    %c0_i32_0 = arith.constant 0 : i32
    %c0_i32_1 = arith.constant 0 : i32
    return %c0_i32, %c0_i32_0 : i32, i32
  }
  func.func @transform_4(%arg0: i32) -> (i32, i32) {
    %c0_i32 = arith.constant 0 : i32
    %c0_i32_0 = arith.constant 0 : i32
    %c0_i32_1 = arith.constant 0 : i32
    return %c0_i32, %c0_i32_0 : i32, i32
  }
  func.func @transform_5(%arg0: i32) -> (i32, i32) {
    %c0_i32 = arith.constant 0 : i32
    %c0_i32_0 = arith.constant 0 : i32
    %c0_i32_1 = arith.constant 0 : i32
    return %c0_i32, %c0_i32_0 : i32, i32
  }
  func.func @transform_6(%arg0: i32) -> (i32, i32) {
    %c0_i32 = arith.constant 0 : i32
    %c0_i32_0 = arith.constant 0 : i32
    %c0_i32_1 = arith.constant 0 : i32
    return %c0_i32, %c0_i32_0 : i32, i32
  }
  func.func @transform_7(%arg0: i32) -> (i32, i32) {
    %c0_i32 = arith.constant 0 : i32
    %c0_i32_0 = arith.constant 0 : i32
    return %arg0, %c0_i32 : i32, i32
  }
}

</mosaic_0001>

<bundles_post_ra>
// kernel: feed_forward_layer.1
= control target key start
LH: loop header
LB: loop body
LE: loop exit
PB: predicated region body
PF: predicated region fallthrough
CT: control target
= control target key end

     0   :  { %12 = vsyncpa [#allocation3], 0  ;;  %s910_s0 = inlined_call_operand.hbm [shape: f32[16,128], index: 0, kind: input, shape index: {}]   ;;  %s911_s1 = inlined_call_operand.hbm [shape: f32[1,128], index: 1, kind: input, shape index: {}]   ;;  %s912_s2 = inlined_call_operand.hbm [shape: f32[1,128], index: 2, kind: input, shape index: {}]   ;;  %s913_s3 = inlined_call_operand.hbm [shape: f32[128,256], index: 3, kind: input, shape index: {}]   ;;  %s914_s4 = inlined_call_operand.hbm [shape: f32[1,256], index: 4, kind: input, shape index: {}]   ;;  %s915_s5 = inlined_call_operand.hbm [shape: f32[256,128], index: 5, kind: input, shape index: {}]   ;;  %s916_s6 = inlined_call_operand.hbm [shape: f32[1,128], index: 6, kind: input, shape index: {}]   ;;  %s917_s7 = inlined_call_operand.hbm [shape: f32[16,128], index: 7, kind: output, shape index: {}]  }
   0x1   :  { %13 = vsyncpa [#allocation6], 0 }
   0x2   :  { %14 = vsyncpa [#allocation9], 0 }
   0x3   :  { %15 = vsyncpa [#allocation12], 0 }
   0x4   :  { %16 = vsyncpa [#allocation4], 0  ;;  %s726_s24 = smov [#allocation5]   ;;  %s727_s26 = smov [#allocation8]  }
   0x5   :  { %s35_s25 = sshll.u32 %s726_s24, 4  ;;  %s54_s27 = sshll.u32 %s727_s26, 4  ;;  %s36_s25 = int_to_ptr.vmem [resolvable:$true] %s35_s25  ;;  %s779_s27 = int_to_ptr.vmem [resolvable:$true] %s54_s27 }
   0x6   :  { %s540_s30 = scalar_lea.hbm %s911_s1, 16 }
   0x7   :  { %p541_p0 = scmp.ne.s32.totalorder %s911_s1, %s540_s30  ;;  %p544_p1 = scmp.lt.u32.totalorder %s540_s30, %s911_s1 }
   0x9   :  { %p546_p2 = pnand %p544_p1, %p541_p0 }
   0xb   :  { %549 = shalt.err (!%p546_p2)
}
   0xc   :  { %s550_s12 = scalar_lea.vmem %s36_s25, 16  ;;  %s554_s13 = scalar_lea.vmem %s36_s25, 32 }
   0xd   :  { %p551_p3 = scmp.ne.s32.totalorder %s36_s25, %s550_s12  ;;  %p555_p4 = scmp.lt.s32.totalorder %s36_s25, %s36_s25 }
   0xe   :  { %p556_p5 = scmp.lt.s32.totalorder %s554_s13, %s550_s12 }
  0x10   :  { %p557_p6 = por %p556_p5, %p555_p4 }
  0x12   :  { %p558_p7 = pnand %p557_p6, %p551_p3 }
  0x14   :  { %561 = shalt.err (!%p558_p7)
}
  0x15   :  { %38 = dma.hbm_to_vmem [thread:$0]  %s911_s1, 16, %s36_s25, [#allocation6]  }
  0x16   :  { %s562_s18 = scalar_lea.hbm %s913_s3, 4096 }
  0x17   :  { %p563_p8 = scmp.ne.s32.totalorder %s913_s3, %s562_s18  ;;  %p566_p9 = scmp.lt.u32.totalorder %s562_s18, %s913_s3 }
  0x19   :  { %p568_p10 = pnand %p566_p9, %p563_p8 }
  0x1b   :  { %571 = shalt.err (!%p568_p10)
}
  0x1c   :  { %s572_s23 = scalar_lea.vmem %s779_s27, 4096  ;;  %p577_p12 = scmp.lt.s32.totalorder %s779_s27, %s779_s27 }
  0x1d   :  { %p573_p11 = scmp.ne.s32.totalorder %s779_s27, %s572_s23  ;;  %p578_p13 = scmp.lt.s32.totalorder %s572_s23, %s572_s23 }
  0x1f   :  { %p579_p0 = por %p578_p13, %p577_p12 }
  0x21   :  { %p580_p1 = pnand %p579_p0, %p573_p11 }
  0x23   :  { %583 = shalt.err (!%p580_p1)
}
  0x24   :  { %s728_s1 = smov 256   ;;  %s729_s24 = smov 16  }
  0x25   :  { %60 = dma.hbm_to_vmem [thread:$0]  %s913_s3, 4096, %s779_s27, [#allocation9], %s728_s1, %s728_s1, %s729_s24  }
  0x26   :  { %s730_s28 = smov [#allocation11]   ;;  %s731_s30 = smov [#allocation2]  }
  0x27   :  { %s76_s29 = sshll.u32 %s730_s28, 4  ;;  %s22_s8 = sshll.u32 %s731_s30, 4  ;;  %s77_s29 = int_to_ptr.vmem [resolvable:$true] %s76_s29  ;;  %s810_s8 = int_to_ptr.vmem [resolvable:$true] %s22_s8 }
  0x28   :  { %s584_s11 = scalar_lea.hbm %s915_s5, 4096 }
  0x29   :  { %p585_p2 = scmp.ne.s32.totalorder %s915_s5, %s584_s11  ;;  %p588_p3 = scmp.lt.u32.totalorder %s584_s11, %s915_s5 }
  0x2b   :  { %p590_p4 = pnand %p588_p3, %p585_p2 }
  0x2d   :  { %593 = shalt.err (!%p590_p4)
}
  0x2e   :  { %s594_s3 = scalar_lea.vmem %s77_s29, 4096  ;;  %p599_p6 = scmp.lt.s32.totalorder %s77_s29, %s77_s29 }
  0x2f   :  { %p595_p5 = scmp.ne.s32.totalorder %s77_s29, %s594_s3  ;;  %p600_p7 = scmp.lt.s32.totalorder %s594_s3, %s594_s3 }
  0x31   :  { %p601_p8 = por %p600_p7, %p599_p6 }
  0x33   :  { %p602_p9 = pnand %p601_p8, %p595_p5 }
  0x35   :  { %605 = shalt.err (!%p602_p9)
}
  0x36   :  { %s732_s27 = smov 128   ;;  %s733_s16 = smov 8  }
  0x37   :  { %82 = dma.hbm_to_vmem [thread:$0]  %s915_s5, 4096, %s77_s29, [#allocation12], %s732_s27, %s732_s27, %s733_s16  }
  0x38   :  { %s606_s21 = scalar_lea.hbm %s910_s0, 256 }
  0x39   :  { %p607_p10 = scmp.ne.s32.totalorder %s910_s0, %s606_s21  ;;  %p610_p11 = scmp.lt.u32.totalorder %s606_s21, %s910_s0 }
  0x3b   :  { %p612_p12 = pnand %p610_p11, %p607_p10 }
  0x3d   :  { %615 = shalt.err (!%p612_p12)
}
  0x3e   :  { %s616_s25 = scalar_lea.vmem %s810_s8, 256  ;;  %p621_p0 = scmp.lt.s32.totalorder %s810_s8, %s810_s8 }
  0x3f   :  { %p617_p13 = scmp.ne.s32.totalorder %s810_s8, %s616_s25  ;;  %p622_p1 = scmp.lt.s32.totalorder %s616_s25, %s616_s25 }
  0x41   :  { %p623_p2 = por %p622_p1, %p621_p0 }
  0x43   :  { %p624_p3 = pnand %p623_p2, %p617_p13 }
  0x45   :  { %627 = shalt.err (!%p624_p3)
}
  0x46   :  { %28 = dma.hbm_to_vmem [thread:$0]  %s910_s0, 256, %s810_s8, [#allocation3], %s732_s27, %s732_s27, %s733_s16  }
  0x47   :  { %s734_s28 = smov [#allocation7]   ;;  %s735_s30 = smov [#allocation10]  }
  0x48   :  { %s45_s29 = sshll.u32 %s734_s28, 4  ;;  %s67_s9 = sshll.u32 %s735_s30, 4  ;;  %s46_s29 = int_to_ptr.vmem [resolvable:$true] %s45_s29  ;;  %s68_s9 = int_to_ptr.vmem [resolvable:$true] %s67_s9 }
  0x49   :  { %s628_s12 = scalar_lea.hbm %s912_s2, 16 }
  0x4a   :  { %p629_p4 = scmp.ne.s32.totalorder %s912_s2, %s628_s12  ;;  %p632_p5 = scmp.lt.u32.totalorder %s628_s12, %s912_s2 }
  0x4c   :  { %p634_p6 = pnand %p632_p5, %p629_p4 }
  0x4e   :  { %637 = shalt.err (!%p634_p6)
}
  0x4f   :  { %s638_s0 = scalar_lea.vmem %s46_s29, 16  ;;  %s642_s8 = scalar_lea.vmem %s46_s29, 32 }
  0x50   :  { %p639_p7 = scmp.ne.s32.totalorder %s46_s29, %s638_s0  ;;  %p643_p8 = scmp.lt.s32.totalorder %s46_s29, %s46_s29 }
  0x51   :  { %p644_p9 = scmp.lt.s32.totalorder %s642_s8, %s638_s0 }
  0x53   :  { %p645_p10 = por %p644_p9, %p643_p8 }
  0x55   :  { %p646_p11 = pnand %p645_p10, %p639_p7 }
  0x57   :  { %649 = shalt.err (!%p646_p11)
}
  0x58   :  { %48 = dma.hbm_to_vmem [thread:$0]  %s912_s2, 16, %s46_s29, [#allocation6]  }
  0x59   :  { %s650_s21 = scalar_lea.hbm %s914_s4, 32 }
  0x5a   :  { %p651_p12 = scmp.ne.s32.totalorder %s914_s4, %s650_s21  ;;  %p654_p13 = scmp.lt.u32.totalorder %s650_s21, %s914_s4 }
  0x5c   :  { %p656_p0 = pnand %p654_p13, %p651_p12 }
  0x5e   :  { %659 = shalt.err (!%p656_p0)
}
  0x5f   :  { %s660_s25 = scalar_lea.vmem %s68_s9, 32  ;;  %p665_p2 = scmp.lt.s32.totalorder %s68_s9, %s68_s9 }
  0x60   :  { %p661_p1 = scmp.ne.s32.totalorder %s68_s9, %s660_s25  ;;  %p666_p3 = scmp.lt.s32.totalorder %s660_s25, %s660_s25 }
  0x62   :  { %p667_p4 = por %p666_p3, %p665_p2 }
  0x64   :  { %p668_p5 = pnand %p667_p4, %p661_p1 }
  0x66   :  { %671 = shalt.err (!%p668_p5)
}
  0x67   :  { %70 = dma.hbm_to_vmem [thread:$0]  %s914_s4, 32, %s68_s9, [#allocation9]  }
  0x68   :  { %s736_s26 = smov [#allocation13]   ;;  %s672_s10 = scalar_lea.hbm %s916_s6, 16 }
  0x69   :  { %s89_s28 = sshll.u32 %s736_s26, 4  ;;  %p673_p6 = scmp.ne.s32.totalorder %s916_s6, %s672_s10  ;;  %s90_s28 = int_to_ptr.vmem [resolvable:$true] %s89_s28 }
  0x6a   :  { %p676_p7 = scmp.lt.u32.totalorder %s672_s10, %s916_s6 }
  0x6c   :  { %p678_p8 = pnand %p676_p7, %p673_p6 }
  0x6e   :  { %681 = shalt.err (!%p678_p8)
}
  0x6f   :  { %s682_s15 = scalar_lea.vmem %s90_s28, 16  ;;  %s686_s4 = scalar_lea.vmem %s90_s28, 32 }
  0x70   :  { %p683_p9 = scmp.ne.s32.totalorder %s90_s28, %s682_s15  ;;  %p687_p10 = scmp.lt.s32.totalorder %s90_s28, %s90_s28 }
  0x71   :  { %p688_p11 = scmp.lt.s32.totalorder %s686_s4, %s682_s15 }
  0x73   :  { %p689_p12 = por %p688_p11, %p687_p10 }
  0x75   :  { %p690_p13 = pnand %p689_p12, %p683_p9 }
  0x77   :  { %693 = shalt.err (!%p690_p13)
}
  0x78   :  { %92 = dma.hbm_to_vmem [thread:$0]  %s916_s6, 16, %s90_s28, [#allocation12]  }
  0x79   :  { %716 = dma.done.wait [#allocation3], 256  }
  0x7a   :  { %717 = vsyncadd [#allocation3], 4294967040 }
  0x7b   :  { %718 = dma.done.wait [#allocation6], 32  }
  0x7c   :  { %719 = vsyncadd [#allocation6], 4294967264 }
  0x7d   :  { %720 = dma.done.wait [#allocation9], 4128  }
  0x7e   :  { %721 = vsyncadd [#allocation9], 4294963168 }
  0x7f   :  { %722 = dma.done.wait [#allocation12], 4112  }
  0x80   :  { %723 = vsyncadd [#allocation12], 4294963184  ;;  %v114_v0 = vld [vmem:[#allocation2] sm:$0xff]  ;;  %v115_v1 = vld [vmem:[#allocation2 + $0x8] sm:$0xff]  ;;  %v737_v53 = vmov 0.0   ;;  %s738_s6 = smov [#allocation14]  }
  0x81   :  { %116 = vadd.xlane.f32.xlu0 %v114_v0  ;;  %v158_v2 = vld [vmem:[#allocation8 + $0x8] sm:$0xff]  ;;  %v160_v3 = vld [vmem:[#allocation8 + $0x18] sm:$0xff]  ;;  %v157_v4 = vld [vmem:[#allocation8] sm:$0xff]  ;;  %265 = vmatprep.mubr.f32.mxu0 %v737_v53  ;;  %s403_s0 = sshll.u32 %s738_s6, 4  ;;  %s404_s0 = int_to_ptr.vmem [resolvable:$true] %s403_s0 }
  0x82   :  { %v459_v5 = vpack.c.bf16 %v160_v3, %v158_v2  ;;  %v159_v6 = vld [vmem:[#allocation8 + $0x10] sm:$0xff]  ;;  %v162_v7 = vld [vmem:[#allocation8 + $0x28] sm:$0xff]  ;;  %v164_v8 = vld [vmem:[#allocation8 + $0x38] sm:$0xff]  ;;  %s694_s8 = scalar_lea.vmem %s404_s0, 256  ;;  %p699_p1 = scmp.lt.s32.totalorder %s404_s0, %s404_s0 }
  0x83   :  { %v461_v9 = vpack.c.bf16 %v159_v6, %v157_v4  ;;  %v463_v10 = vpack.c.bf16 %v164_v8, %v162_v7  ;;  %v161_v11 = vld [vmem:[#allocation8 + $0x20] sm:$0xff]  ;;  %v163_v12 = vld [vmem:[#allocation8 + $0x30] sm:$0xff]  ;;  %v166_v13 = vld [vmem:[#allocation8 + $0x48] sm:$0xff]  ;;  %p695_p0 = scmp.ne.s32.totalorder %s404_s0, %s694_s8  ;;  %p700_p2 = scmp.lt.s32.totalorder %s694_s8, %s694_s8 }
  0x84   :  { %460 = vmatprep.subr.bf16.mxu0 %v459_v5  ;;  %v168_v14 = vld [vmem:[#allocation8 + $0x58] sm:$0xff]  ;;  %v465_v15 = vpack.c.bf16 %v163_v12, %v161_v11  ;;  %v165_v17 = vld [vmem:[#allocation8 + $0x40] sm:$0xff]  ;;  %v167_v18 = vld [vmem:[#allocation8 + $0x50] sm:$0xff] }
  0x85   :  { %118 = vadd.xlane.f32.xlu0 %v115_v1  ;;  %462 = vmatpush1.bf16.msra.mxu0 %v461_v9  ;;  %v467_v16 = vpack.c.bf16 %v168_v14, %v166_v13  ;;  %v469_v19 = vpack.c.bf16 %v167_v18, %v165_v17  ;;  %v170_v28 = vld [vmem:[#allocation8 + $0x68] sm:$0xff]  ;;  %v172_v29 = vld [vmem:[#allocation8 + $0x78] sm:$0xff]  ;;  %v169_v31 = vld [vmem:[#allocation8 + $0x60] sm:$0xff]  ;;  %p701_p3 = por %p700_p2, %p699_p1 }
  0x86   :  { %464 = vmatprep.subr.bf16.mxu0 %v463_v10  ;;  %v471_v30 = vpack.c.bf16 %v172_v29, %v170_v28  ;;  %v171_v32 = vld [vmem:[#allocation8 + $0x70] sm:$0xff]  ;;  %v174_v34 = vld [vmem:[#allocation8 + $0x88] sm:$0xff]  ;;  %v176_v35 = vld [vmem:[#allocation8 + $0x98] sm:$0xff] }
  0x87   :  { %v473_v33 = vpack.c.bf16 %v171_v32, %v169_v31  ;;  %v475_v36 = vpack.c.bf16 %v176_v35, %v174_v34  ;;  %v173_v37 = vld [vmem:[#allocation8 + $0x80] sm:$0xff]  ;;  %v175_v38 = vld [vmem:[#allocation8 + $0x90] sm:$0xff]  ;;  %v178_v40 = vld [vmem:[#allocation8 + $0xa8] sm:$0xff]  ;;  %p702_p4 = pnand %p701_p3, %p695_p0 }
  0x88   :  { %v477_v39 = vpack.c.bf16 %v175_v38, %v173_v37  ;;  %v180_v41 = vld [vmem:[#allocation8 + $0xb8] sm:$0xff]  ;;  %v177_v43 = vld [vmem:[#allocation8 + $0xa0] sm:$0xff]  ;;  %v179_v44 = vld [vmem:[#allocation8 + $0xb0] sm:$0xff] }
  0x89   :  { %466 = vmatpush1.bf16.msra.mxu0 %v465_v15  ;;  %v479_v42 = vpack.c.bf16 %v180_v41, %v178_v40  ;;  %v481_v45 = vpack.c.bf16 %v179_v44, %v177_v43  ;;  %v182_v46 = vld [vmem:[#allocation8 + $0xc8] sm:$0xff]  ;;  %v184_v47 = vld [vmem:[#allocation8 + $0xd8] sm:$0xff]  ;;  %v181_v48 = vld [vmem:[#allocation8 + $0xc0] sm:$0xff] }
  0x8a   :  { %468 = vmatprep.subr.bf16.mxu0 %v467_v16  ;;  %v483_v49 = vpack.c.bf16 %v184_v47, %v182_v46  ;;  %v183_v50 = vld [vmem:[#allocation8 + $0xd0] sm:$0xff]  ;;  %v186_v51 = vld [vmem:[#allocation8 + $0xe8] sm:$0xff]  ;;  %v188_v52 = vld [vmem:[#allocation8 + $0xf8] sm:$0xff] }
  0x8b   :  { %v485_v54 = vpack.c.bf16 %v183_v50, %v181_v48  ;;  %v487_v55 = vpack.c.bf16 %v188_v52, %v186_v51  ;;  %v185_v56 = vld [vmem:[#allocation8 + $0xe0] sm:$0xff]  ;;  %v187_v57 = vld [vmem:[#allocation8 + $0xf0] sm:$0xff]  ;;  %v418_v43 = vld [vmem:[#allocation5] ss:$0 sm:$0xff] }
  0x8c   :  { %v489_v58 = vpack.c.bf16 %v187_v57, %v185_v56  ;;  %v298_v59 = vld [vmem:[#allocation11 + $0x80] sm:$0xff]  ;;  %v299_v60 = vld [vmem:[#allocation11 + $0x88] sm:$0xff]  ;;  %v284_v4 = vld [vmem:[#allocation11 + $0x10] sm:$0xff] }
  0x8d   :  { %470 = vmatpush1.bf16.msra.mxu0 %v469_v19  ;;  %v282_v61 = vld [vmem:[#allocation11] sm:$0xff]  ;;  %v491_v62 = vpack.c.bf16 %v299_v60, %v298_v59  ;;  %v283_v63 = vld [vmem:[#allocation11 + $0x8] sm:$0xff]  ;;  %v285_v5 = vld [vmem:[#allocation11 + $0x18] sm:$0xff] }
  0x8e   :  { %472 = vmatprep.subr.bf16.mxu0 %v471_v30  ;;  %v493_v2 = vpack.c.bf16 %v283_v63, %v282_v61  ;;  %v302_v6 = vld [vmem:[#allocation11 + $0xa0] sm:$0xff]  ;;  %v303_v7 = vld [vmem:[#allocation11 + $0xa8] sm:$0xff]  ;;  %v497_v8 = vpack.c.bf16 %v285_v5, %v284_v4  ;;  %v304_v12 = vld [vmem:[#allocation11 + $0xb0] sm:$0xff]  ;;  %v191_v61 = vlaneseq }
  0x8f   :  { %492 = vmatprep.subr.bf16.mxu1 %v491_v62  ;;  %v499_v9 = vpack.c.bf16 %v303_v7, %v302_v6  ;;  %v286_v10 = vld [vmem:[#allocation11 + $0x20] sm:$0xff]  ;;  %v287_v11 = vld [vmem:[#allocation11 + $0x28] sm:$0xff]  ;;  %v305_v13 = vld [vmem:[#allocation11 + $0xb8] sm:$0xff] }
  0x90   :  { %494 = vmatpush3.bf16.msra.mxu1 %v493_v2  ;;  %v501_v14 = vpack.c.bf16 %v287_v11, %v286_v10  ;;  %v503_v15 = vpack.c.bf16 %v305_v13, %v304_v12  ;;  %v288_v16 = vld [vmem:[#allocation11 + $0x30] sm:$0xff]  ;;  %v289_v17 = vld [vmem:[#allocation11 + $0x38] sm:$0xff]  ;;  %v306_v18 = vld [vmem:[#allocation11 + $0xc0] sm:$0xff] }
  0x91   :  { %474 = vmatpush1.bf16.msra.mxu0 %v473_v33  ;;  %v307_v19 = vld [vmem:[#allocation11 + $0xc8] sm:$0xff]  ;;  %v292_v30 = vld [vmem:[#allocation11 + $0x50] sm:$0xff]  ;;  %v293_v31 = vld [vmem:[#allocation11 + $0x58] sm:$0xff] }
  0x92   :  { %476 = vmatprep.subr.bf16.mxu0 %v475_v36  ;;  %v310_v32 = vld [vmem:[#allocation11 + $0xe0] sm:$0xff]  ;;  %v311_v33 = vld [vmem:[#allocation11 + $0xe8] sm:$0xff]  ;;  %v513_v34 = vpack.c.bf16 %v293_v31, %v292_v30  ;;  %v312_v56 = vld [vmem:[#allocation11 + $0xf0] sm:$0xff] }
  0x93   :  { %v515_v35 = vpack.c.bf16 %v311_v33, %v310_v32  ;;  %v294_v52 = vld [vmem:[#allocation11 + $0x60] sm:$0xff]  ;;  %v313_v57 = vld [vmem:[#allocation11 + $0xf8] sm:$0xff] }
  0x94   :  { %v297_v59 = vld [vmem:[#allocation11 + $0x78] sm:$0xff] }
  0x95   :  { %478 = vmatpush1.bf16.msra.mxu0 %v477_v39  ;;  %v189_v63 = vld [vmem:[#allocation10] sm:$0x3] }
  0x96   :  { %480 = vmatprep.subr.bf16.mxu0 %v479_v42 }
  0x99   :  { %482 = vmatpush1.bf16.msra.mxu0 %v481_v45  ;;  %v419_v45 = vld [vmem:[#allocation7] ss:$0 sm:$0xff] }
  0x9a   :  { %484 = vmatprep.subr.bf16.mxu0 %v483_v49 }
  0x9d   :  { %486 = vmatpush1.bf16.msra.mxu0 %v485_v54  ;;  %v295_v54 = vld [vmem:[#allocation11 + $0x68] sm:$0xff] }
  0x9e   :  { %488 = vmatprep.subr.bf16.mxu0 %v487_v55  ;;  %v517_v55 = vpack.c.bf16 %v295_v54, %v294_v52 }
  0xa1   :  { %490 = vmatpush1.bf16.msra.mxu0 %v489_v58  ;;  %v519_v58 = vpack.c.bf16 %v313_v57, %v312_v56 }
 0x10e   :  { %v117_v20 = vpop.xlane.xlu0 %116 }
 0x10f   :  { %v121_v21 = vmul.f32 0.0078125, %v117_v20  ;;  %v505_v20 = vpack.c.bf16 %v289_v17, %v288_v16 }
 0x111   :  { %v883_v22 = vsub.f32 %v114_v0, %v121_v21  ;;  %v300_v0 = vld [vmem:[#allocation11 + $0x90] sm:$0xff]  ;;  %v507_v21 = vpack.c.bf16 %v307_v19, %v306_v18 }
 0x112   :  { %v119_v23 = vpop.xlane.xlu0 %118 }
 0x113   :  { %v122_v24 = vmul.f32 0.0078125, %v119_v23  ;;  %v125_v25 = vmul.f32 %v883_v22, %v883_v22  ;;  %v290_v23 = vld [vmem:[#allocation11 + $0x40] sm:$0xff] }
 0x115   :  { %v887_v26 = vsub.f32 %v115_v1, %v122_v24  ;;  %127 = vadd.xlane.f32.xlu1 %v125_v25  ;;  %v301_v1 = vld [vmem:[#allocation11 + $0x98] sm:$0xff]  ;;  %v291_v24 = vld [vmem:[#allocation11 + $0x48] sm:$0xff]  ;;  %v308_v25 = vld [vmem:[#allocation11 + $0xd0] sm:$0xff] }
 0x116   :  { %v495_v3 = vpack.c.bf16 %v301_v1, %v300_v0  ;;  %v509_v28 = vpack.c.bf16 %v291_v24, %v290_v23 }
 0x117   :  { %v126_v27 = vmul.f32 %v887_v26, %v887_v26 }
 0x118   :  { %496 = vmatprep.subr.bf16.mxu1 %v495_v3 }
 0x119   :  { %129 = vadd.xlane.f32.xlu1 %v126_v27  ;;  %498 = vmatpush3.bf16.msra.mxu1 %v497_v8  ;;  %v309_v27 = vld [vmem:[#allocation11 + $0xd8] sm:$0xff] }
 0x11a   :  { %500 = vmatprep.subr.bf16.mxu1 %v499_v9  ;;  %v511_v29 = vpack.c.bf16 %v309_v27, %v308_v25 }
 0x11d   :  { %502 = vmatpush3.bf16.msra.mxu1 %v501_v14 }
 0x11e   :  { %504 = vmatprep.subr.bf16.mxu1 %v503_v15  ;;  %v420_v15 = vld [vmem:[#allocation13] ss:$0 sm:$0xff] }
 0x121   :  { %506 = vmatpush3.bf16.msra.mxu1 %v505_v20 }
 0x122   :  { %508 = vmatprep.subr.bf16.mxu1 %v507_v21 }
 0x125   :  { %510 = vmatpush3.bf16.msra.mxu1 %v509_v28 }
 0x126   :  { %512 = vmatprep.subr.bf16.mxu1 %v511_v29 }
 0x129   :  { %514 = vmatpush3.bf16.msra.mxu1 %v513_v34 }
 0x12a   :  { %516 = vmatprep.subr.bf16.mxu1 %v515_v35 }
 0x12d   :  { %518 = vmatpush3.bf16.msra.mxu1 %v517_v55 }
 0x12e   :  { %520 = vmatprep.subr.bf16.mxu1 %v519_v58 }
 0x1a2   :  { %v128_v36 = vpop.xlane.xlu1 %127 }
 0x1a3   :  { %v131_v37 = vmul.f32 0.0078125, %v128_v36 }
 0x1a5   :  { %v133_v38 = vadd.f32 1e-05, %v131_v37 }
 0x1a6   :  { %v130_v39 = vpop.xlane.xlu1 %129 }
 0x1a7   :  { %536 = vrsqrt.f32 %v133_v38  ;;  %v132_v40 = vmul.f32 0.0078125, %v130_v39 }
 0x1a9   :  { %v134_v41 = vadd.f32 1e-05, %v132_v40 }
 0x1ab   :  { %538 = vrsqrt.f32 %v134_v41 }
 0x1b1   :  { %v537_v42 = vpop.eup %536 }
 0x1b2   :  { %v137_v44 = vmul.f32 %v537_v42, %v883_v22  ;;  %v296_v22 = vld [vmem:[#allocation11 + $0x70] sm:$0xff] }
 0x1b3   :  { %v521_v60 = vpack.c.bf16 %v297_v59, %v296_v22 }
 0x1b4   :  { %v146_v46 = vmul.f32 %v418_v43, %v137_v44 }
 0x1b5   :  { %v539_v47 = vpop.eup %538  ;;  %522 = vmatpush3.bf16.msra.mxu1 %v521_v60 }
 0x1b6   :  { %v155_v48 = vadd.f32 %v419_v45, %v146_v46  ;;  %v138_v49 = vmul.f32 %v539_v47, %v887_v26  ;;  %v192_v26 = vshrl.u32 %v191_v61, 7 }
 0x1b8   :  { %266 = vmatmul.mubr.f32.vlgmr.msra.gmra.mrb[0].mxu0 %v155_v48  ;;  %v147_v50 = vmul.f32 %v418_v43, %v138_v49  ;;  %v193_v62 = vsub.s32 0, %v192_v26  ;;  %v197_v0 = vsub.s32 1, %v192_v26 }
 0x1b9   :  { %271 = vmatprep.mubr.f32.mxu0 %v737_v53 }
 0x1ba   :  { %v156_v51 = vadd.f32 %v419_v45, %v147_v50  ;;  %v194_v53 = vrot.slane %v189_v63, %v193_v62  ;;  %v198_v1 = vrot.slane %v189_v63, %v197_v0 }
 0x1bc   :  { %272 = vmatmul.mubr.f32.gmra.mrb[2].mxu0 %v156_v51 }
 0x28b   :  { %v267_v2 = vpop.f32.mrb[0].mxu0 }
 0x28c   :  { %v268_v3 = vadd.f32 %v267_v2, %v194_v53  ;;  %v269_v4 = vpop.f32.mrb[1].mxu0 }
 0x28d   :  { %v270_v5 = vadd.f32 %v269_v4, %v198_v1 }
 0x28e   :  { %v278_v8 = vmax.f32 %v268_v3, 0.0 }
 0x28f   :  { %v273_v6 = vpop.f32.mrb[2].mxu0  ;;  %v279_v7 = vmax.f32 %v270_v5, 0.0 }
 0x290   :  { %v274_v9 = vadd.f32 %v273_v6, %v194_v53  ;;  %v275_v10 = vpop.f32.mrb[3].mxu0 }
 0x291   :  { %v276_v11 = vadd.f32 %v275_v10, %v198_v1  ;;  %385 = vmatprep.mubr.f32.mxu1 %v279_v7 }
 0x292   :  { %386 = vmatmul.mubr.f32.vlgmr.msra.gmra.mrb[0].mxu1 %v278_v8  ;;  %v280_v13 = vmax.f32 %v274_v9, 0.0 }
 0x293   :  { %v281_v12 = vmax.f32 %v276_v11, 0.0 }
 0x295   :  { %390 = vmatprep.mubr.f32.mxu1 %v281_v12 }
 0x296   :  { %391 = vmatmul.mubr.f32.gmra.mrb[2].mxu1 %v280_v13 }
 0x365   :  { %v453_v14 = vpop.f32.mrb[0].mxu1 }
 0x366   :  { %v454_v16 = vpop.f32.mrb[1].mxu1 }
 0x367   :  { %v455_v17 = vadd.f32 %v454_v16, %v453_v14 }
 0x369   :  { %v388_v18 = vadd.f32 %v455_v17, %v420_v15  ;;  %v456_v19 = vpop.f32.mrb[2].mxu1 }
 0x36a   :  { %v457_v20 = vpop.f32.mrb[3].mxu1 }
 0x36b   :  { %396 = vst [vmem:[#allocation14] sm:$0xff] %v388_v18  ;;  %v458_v21 = vadd.f32 %v457_v20, %v456_v19 }
 0x36d   :  { %v393_v23 = vadd.f32 %v458_v21, %v420_v15 }
 0x36f   :  { %397 = vst [vmem:[#allocation14 + $0x8] sm:$0xff] %v393_v23 }
 0x370   :  { %705 = shalt.err (!%p702_p4)
}
 0x371   :  { %s706_s19 = scalar_lea.hbm %s917_s7, 256 }
 0x372   :  { %p707_p5 = scmp.ne.s32.totalorder %s917_s7, %s706_s19  ;;  %p710_p6 = scmp.lt.u32.totalorder %s706_s19, %s917_s7 }
 0x374   :  { %p712_p7 = pnand %p710_p6, %p707_p5 }
 0x376   :  { %715 = shalt.err (!%p712_p7)
}
 0x377   :  { %409 = dma.vmem_to_hbm [thread:$0]  %s404_s0, 256, %s917_s7, [#allocation4], %s732_s27, %s732_s27, %s733_s16  }
 0x378   :  { %724 = dma.done.wait [#allocation4], 256  }
 0x379   :  { %725 = vsyncadd [#allocation4], 4294967040 }
 0x37a   :  { %413 = vsyncpa [#allocation3], 1 }
 0x37b   :  { %414 = vsyncpa [#allocation6], 1 }
 0x37c   :  { %415 = vsyncpa [#allocation9], 1 }
 0x37d   :  { %416 = vsyncpa [#allocation12], 1 }
 0x37e   :  { %417 = vsyncpa [#allocation4], 1 }

</bundles_post_ra>
